<compile_context>
chip_gen: v5e
topology: v5e:2x2
jax: 0.10.0
libtpu: 0.0.40
codegen_flags: <defaults>
</compile_context>

<pallas_src>
import functools

import jax
import jax.numpy as jnp
from jax import lax
from jax.experimental import pallas as pl
from jax.experimental.pallas import tpu as pltpu


def friendly_block_kernel(x_ref, masks_ref, wtaps_ref, bias_ref, o_ref,
                          *, W, HW, K, P, B):
    """One grid step = B images, each (C, HW) with HW on the lane axis.

    x_ref:     (B, C, HW)        inputs
    masks_ref: (2*(K-1), HW)     f32 edge masks (horizontal taps, then vertical)
    wtaps_ref: (2*K-1, OUP, C)   folded per-tap 1x1 weights (merged center first)
    bias_ref:  (OUP, 1)          fully folded bias (conv biases + both BNs)
    o_ref:     (B, OUP, HW)      lane-dense output
    """
    ntap = 2 * K - 1
    # Grid-invariant loads hoisted above the image loop.
    masks = masks_ref[...]
    bias = bias_ref[...]
    wtaps = [wtaps_ref[t] for t in range(ntap)]

    # Static tap schedule: (wtap index, lane shift, mask row). Center tap first.
    sched = []
    m = 0
    for k in range(K):                       # horizontal taps (1 x K conv)
        if k == P:
            continue
        sched.append((len(sched) + 1, (-(k - P)) % HW, m))
        m += 1
    for k in range(K):                       # vertical taps (K x 1 conv)
        if k == P:
            continue
        sched.append((len(sched) + 1, (-(k - P) * W) % HW, m))
        m += 1

    for b in range(B):                       # B small & static -> unrolled
        x = x_ref[b]                         # (C, HW)
        # Center tap (both branches merged): accumulator init, no zeros.
        z = jnp.dot(wtaps[0], x, preferred_element_type=jnp.float32)
        for t, shift, mrow in sched:
            # roll along lanes (XLU slot) + precomputed edge mask (one VPU mul)
            xs = pltpu.roll(x, shift, axis=1) * masks[mrow:mrow + 1, :]
            z = z + jnp.dot(wtaps[t], xs, preferred_element_type=jnp.float32)
        o_ref[b] = jnp.maximum(z + bias, 0.0)   # folded bias + ReLU, lane-dense


def fold_params(w1h, b1h, w1v, b1v,
                bn1_gamma, bn1_beta, bn1_mean, bn1_var,
                w2, b2, bn2_gamma, bn2_beta, bn2_mean, bn2_var, eps, *, P):
    """Fold depthwise taps, conv biases and both eval-mode BNs into
    (wtaps: (2K-1, OUP, C), bias: (OUP, 1))."""
    # TODO(synk): training-mode BatchNorm (batch statistics) not implemented;
    # eval-mode (running-stats) semantics are folded into the weights.
    C, _, _, K = w1h.shape
    OUP = w2.shape[0]
    s1 = bn1_gamma / jnp.sqrt(bn1_var + eps)                  # (2C,)
    s2 = bn2_gamma / jnp.sqrt(bn2_var + eps)                  # (OUP,)
    wh = w1h.reshape(C, K) * s1[:C, None]                     # BN1-scaled taps
    wv = w1v.reshape(C, K) * s1[C:, None]
    W2 = w2.reshape(OUP, 2 * C)
    W2f = W2 * s2[:, None]                                    # BN2-scaled 1x1
    W2h, W2v = W2f[:, :C], W2f[:, C:]
    taps = [W2h * wh[:, P][None, :] + W2v * wv[:, P][None, :]]  # merged center
    taps += [W2h * wh[:, k][None, :] for k in range(K) if k != P]
    taps += [W2v * wv[:, k][None, :] for k in range(K) if k != P]
    wtaps = jnp.stack(taps, axis=0)                           # (2K-1, OUP, C)
    d1 = s1 * (jnp.concatenate([b1h, b1v]) - bn1_mean) + bn1_beta     # (2C,)
    biasf = s2 * (W2 @ d1 + b2 - bn2_mean) + bn2_beta                 # (OUP,)
    return wtaps, biasf.reshape(OUP, 1)


def make_edge_masks(H, W, K, P):
    """f32 (2*(K-1), HW) masks: zero where a shifted tap falls off the image
    (also kills the pltpu.roll lane wraparound)."""
    HW = H * W
    idx = jnp.arange(HW, dtype=jnp.int32)
    w_pos = idx % W
    h_pos = idx // W
    rows = []
    for k in range(K):
        if k == P:
            continue
        s = k - P
        rows.append(((w_pos + s >= 0) & (w_pos + s < W)).astype(jnp.float32))
    for k in range(K):
        if k == P:
            continue
        s = k - P
        rows.append(((h_pos + s >= 0) & (h_pos + s < H)).astype(jnp.float32))
    return jnp.stack(rows, axis=0)


def friendly_block_pallas(x_nchw, wtaps, biasf, *, K, P, batch_block=None):
    """x_nchw: (N, C, H, W) float32.  Returns NCHW output (N, OUP, H, W)."""
    N, C, H, W = x_nchw.shape
    ntap, OUP, _ = wtaps.shape
    HW = H * W
    assert 2 * P == K - 1, "shift-MAC formulation assumes 'same' geometry"
    assert ntap == 2 * K - 1

    # Images per grid step: amortize the ~0.35us/step pipeline overhead while
    # keeping grid >= 2 (both v7x TensorCores busy) and the double-buffered
    # per-step footprint small vs the scoped-VMEM default (~8 MiB budget).
    if batch_block is None:
        vmem_cap = max(1, (8 << 20) // (2 * (C + OUP) * HW * 4))
        batch_block = min(max(1, N // 2), vmem_cap)
        while N % batch_block != 0:
            batch_block -= 1
    B = batch_block
    assert N % B == 0 and B >= 1

    x_flat = x_nchw.reshape(N, C, HW)      # free reshape; no channel-dup copy
    masks = make_edge_masks(H, W, K, P)    # grid-invariant, computed once

    kern = functools.partial(friendly_block_kernel,
                             W=W, HW=HW, K=K, P=P, B=B)
    out = pl.pallas_call(
        kern,
        out_shape=jax.ShapeDtypeStruct((N, OUP, HW), jnp.float32),
        grid=(N // B,),
        in_specs=[
            pl.BlockSpec((B, C, HW), lambda n: (n, 0, 0)),
            pl.BlockSpec((2 * (K - 1), HW), lambda n: (0, 0)),
            pl.BlockSpec((ntap, OUP, C), lambda n: (0, 0, 0)),
            pl.BlockSpec((OUP, 1), lambda n: (0, 0)),
        ],
        out_specs=pl.BlockSpec((B, OUP, HW), lambda n: (n, 0, 0)),
        compiler_params=pltpu.CompilerParams(
            dimension_semantics=("parallel",)),
    )(x_flat, masks, wtaps, biasf)
    return out.reshape(N, OUP, H, W)       # free reshape back to NCHW


if __name__ == "__main__":
    # Small instantiation: FriendlyBlock(inp=4, oup=8, kernel=3, stride=1, padding=1)
    N, C, H, W = 2, 4, 16, 16
    OUP, K, STRIDE, P = 8, 3, 1, 1
    assert STRIDE == 1, "kernel instantiation assumes stride=1"
    eps = 1e-5

    keys = jax.random.split(jax.random.PRNGKey(0), 16)
    f32 = jnp.float32
    # PyTorch parameter shapes (synthetic, deterministic)
    w_conv1h = jax.random.normal(keys[0], (C, 1, 1, K), f32) * 0.3
    b_conv1h = jax.random.normal(keys[1], (C,), f32) * 0.1
    w_conv1v = jax.random.normal(keys[2], (C, 1, K, 1), f32) * 0.3
    b_conv1v = jax.random.normal(keys[3], (C,), f32) * 0.1
    bn1_gamma = 1.0 + 0.1 * jax.random.normal(keys[4], (2 * C,), f32)
    bn1_beta = 0.1 * jax.random.normal(keys[5], (2 * C,), f32)
    bn1_mean = 0.1 * jax.random.normal(keys[6], (2 * C,), f32)
    bn1_var = jnp.abs(jax.random.normal(keys[7], (2 * C,), f32)) + 0.5
    w_conv2 = jax.random.normal(keys[8], (OUP, 2 * C, 1, 1), f32) * 0.2
    b_conv2 = jax.random.normal(keys[9], (OUP,), f32) * 0.1
    bn2_gamma = 1.0 + 0.1 * jax.random.normal(keys[10], (OUP,), f32)
    bn2_beta = 0.1 * jax.random.normal(keys[11], (OUP,), f32)
    bn2_mean = 0.1 * jax.random.normal(keys[12], (OUP,), f32)
    bn2_var = jnp.abs(jax.random.normal(keys[13], (OUP,), f32)) + 0.5

    wtaps, biasf = fold_params(
        w_conv1h, b_conv1h, w_conv1v, b_conv1v,
        bn1_gamma, bn1_beta, bn1_mean, bn1_var,
        w_conv2, b_conv2, bn2_gamma, bn2_beta, bn2_mean, bn2_var, eps, P=P)

    x = jax.random.normal(keys[14], (N, C, H, W), f32)

    out = friendly_block_pallas(x, wtaps, biasf, K=K, P=P)
    out = jax.block_until_ready(out)

    # Pure-JAX reference mirroring the PyTorch forward (NCHW) for sanity.
    def reference(x_nchw):
        dn = ("NCHW", "OIHW", "NCHW")
        o1 = lax.conv_general_dilated(
            x_nchw, w_conv1h, (STRIDE, STRIDE), [(0, 0), (P, P)],
            dimension_numbers=dn, feature_group_count=C)
        o1 = o1 + b_conv1h[None, :, None, None]
        o2 = lax.conv_general_dilated(
            x_nchw, w_conv1v, (STRIDE, STRIDE), [(P, P), (0, 0)],
            dimension_numbers=dn, feature_group_count=C)
        o2 = o2 + b_conv1v[None, :, None, None]
        o = jnp.concatenate([o1, o2], axis=1)
        o = ((o - bn1_mean[None, :, None, None])
             / jnp.sqrt(bn1_var + eps)[None, :, None, None]
             * bn1_gamma[None, :, None, None] + bn1_beta[None, :, None, None])
        o = lax.conv_general_dilated(o, w_conv2, (1, 1), [(0, 0), (0, 0)],
                                     dimension_numbers=dn)
        o = o + b_conv2[None, :, None, None]
        o = ((o - bn2_mean[None, :, None, None])
             / jnp.sqrt(bn2_var + eps)[None, :, None, None]
             * bn2_gamma[None, :, None, None] + bn2_beta[None, :, None, None])
        return jnp.maximum(o, 0.0)

    ref = reference(x)
    assert out.shape == (N, OUP, H, W)
    # Tolerance leaves margin for MXU f32 dot vs the XLA conv path.
    assert jnp.allclose(out, ref, atol=2e-3, rtol=2e-3), \
        float(jnp.max(jnp.abs(out - ref)))
    print("KERNEL_OK")
</pallas_src>

<mosaic_0001>
module attributes {stable_mosaic.version = 11 : i64} {
  func.func @friendly_block_kernel(%arg0: i32, %arg1: memref<1x4x256xf32, #tpu.memory_space<vmem>>, %arg2: memref<4x256xf32, #tpu.memory_space<vmem>>, %arg3: memref<5x8x4xf32, #tpu.memory_space<vmem>>, %arg4: memref<8x1xf32, #tpu.memory_space<vmem>>, %arg5: memref<1x8x256xf32, #tpu.memory_space<vmem>>) attributes {dimension_semantics = [#tpu.dimension_semantics<parallel>], iteration_bounds = array<i64: 2>, scalar_prefetch = 0 : i64, scratch_operands = 0 : i64, tpu.core_type = #tpu.core_type<tc>, window_params = [{transform_indices = @transform_0, window_bounds = array<i64: 1, 4, 256>}, {pipeline_mode = #tpu.pipeline_mode<synchronous>, transform_indices = @transform_1, window_bounds = array<i64: 4, 256>}, {pipeline_mode = #tpu.pipeline_mode<synchronous>, transform_indices = @transform_2, window_bounds = array<i64: 5, 8, 4>}, {pipeline_mode = #tpu.pipeline_mode<synchronous>, transform_indices = @transform_3, window_bounds = array<i64: 8, 1>}, {transform_indices = @transform_4, window_bounds = array<i64: 1, 8, 256>}]} {
    %c0 = arith.constant 0 : index
    %c0_0 = arith.constant 0 : index
    %0 = vector.load %arg2[%c0, %c0_0] : memref<4x256xf32, #tpu.memory_space<vmem>>, vector<4x256xf32>
    %c0_1 = arith.constant 0 : index
    %c0_2 = arith.constant 0 : index
    %1 = vector.load %arg4[%c0_1, %c0_2] : memref<8x1xf32, #tpu.memory_space<vmem>>, vector<8x1xf32>
    %c0_3 = arith.constant 0 : index
    %c0_4 = arith.constant 0 : index
    %c0_5 = arith.constant 0 : index
    %2 = vector.load %arg3[%c0_3, %c0_4, %c0_5] : memref<5x8x4xf32, #tpu.memory_space<vmem>>, vector<1x8x4xf32>
    %3 = vector.shape_cast %2 : vector<1x8x4xf32> to vector<8x4xf32>
    %c1 = arith.constant 1 : index
    %c0_6 = arith.constant 0 : index
    %c0_7 = arith.constant 0 : index
    %4 = vector.load %arg3[%c1, %c0_6, %c0_7] : memref<5x8x4xf32, #tpu.memory_space<vmem>>, vector<1x8x4xf32>
    %5 = vector.shape_cast %4 : vector<1x8x4xf32> to vector<8x4xf32>
    %c2 = arith.constant 2 : index
    %c0_8 = arith.constant 0 : index
    %c0_9 = arith.constant 0 : index
    %6 = vector.load %arg3[%c2, %c0_8, %c0_9] : memref<5x8x4xf32, #tpu.memory_space<vmem>>, vector<1x8x4xf32>
    %7 = vector.shape_cast %6 : vector<1x8x4xf32> to vector<8x4xf32>
    %c3 = arith.constant 3 : index
    %c0_10 = arith.constant 0 : index
    %c0_11 = arith.constant 0 : index
    %8 = vector.load %arg3[%c3, %c0_10, %c0_11] : memref<5x8x4xf32, #tpu.memory_space<vmem>>, vector<1x8x4xf32>
    %9 = vector.shape_cast %8 : vector<1x8x4xf32> to vector<8x4xf32>
    %c4 = arith.constant 4 : index
    %c0_12 = arith.constant 0 : index
    %c0_13 = arith.constant 0 : index
    %10 = vector.load %arg3[%c4, %c0_12, %c0_13] : memref<5x8x4xf32, #tpu.memory_space<vmem>>, vector<1x8x4xf32>
    %11 = vector.shape_cast %10 : vector<1x8x4xf32> to vector<8x4xf32>
    %c0_14 = arith.constant 0 : index
    %c0_15 = arith.constant 0 : index
    %c0_16 = arith.constant 0 : index
    %12 = vector.load %arg1[%c0_14, %c0_15, %c0_16] : memref<1x4x256xf32, #tpu.memory_space<vmem>>, vector<1x4x256xf32>
    %13 = vector.shape_cast %12 : vector<1x4x256xf32> to vector<4x256xf32>
    %cst = arith.constant dense<0.000000e+00> : vector<8x256xf32>
    %14 = tpu.matmul %3, %13, %cst {dimension_numbers = #tpu.dot_dimension_numbers<[1], [0], [0], [1], [0, 0, 1, 1], [], []>} : vector<8x4xf32>, vector<4x256xf32>, vector<8x256xf32> -> vector<8x256xf32>
    %c1_i32 = arith.constant 1 : i32
    %15 = tpu.dynamic_rotate %13 by %c1_i32 dim 1 : vector<4x256xf32>, i32 -> vector<4x256xf32>
    %16 = vector.extract_strided_slice %0 {offsets = [0, 0], sizes = [1, 256], strides = [1, 1]} : vector<4x256xf32> to vector<1x256xf32>
    %17 = vector.broadcast %16 : vector<1x256xf32> to vector<4x256xf32>
    %18 = arith.mulf %15, %17 : vector<4x256xf32>
    %cst_17 = arith.constant dense<0.000000e+00> : vector<8x256xf32>
    %19 = tpu.matmul %5, %18, %cst_17 {dimension_numbers = #tpu.dot_dimension_numbers<[1], [0], [0], [1], [0, 0, 1, 1], [], []>} : vector<8x4xf32>, vector<4x256xf32>, vector<8x256xf32> -> vector<8x256xf32>
    %20 = arith.addf %14, %19 : vector<8x256xf32>
    %c255_i32 = arith.constant 255 : i32
    %21 = tpu.dynamic_rotate %13 by %c255_i32 dim 1 : vector<4x256xf32>, i32 -> vector<4x256xf32>
    %22 = vector.extract_strided_slice %0 {offsets = [1, 0], sizes = [1, 256], strides = [1, 1]} : vector<4x256xf32> to vector<1x256xf32>
    %23 = vector.broadcast %22 : vector<1x256xf32> to vector<4x256xf32>
    %24 = arith.mulf %21, %23 : vector<4x256xf32>
    %cst_18 = arith.constant dense<0.000000e+00> : vector<8x256xf32>
    %25 = tpu.matmul %7, %24, %cst_18 {dimension_numbers = #tpu.dot_dimension_numbers<[1], [0], [0], [1], [0, 0, 1, 1], [], []>} : vector<8x4xf32>, vector<4x256xf32>, vector<8x256xf32> -> vector<8x256xf32>
    %26 = arith.addf %20, %25 : vector<8x256xf32>
    %c16_i32 = arith.constant 16 : i32
    %27 = tpu.dynamic_rotate %13 by %c16_i32 dim 1 : vector<4x256xf32>, i32 -> vector<4x256xf32>
    %28 = vector.extract_strided_slice %0 {offsets = [2, 0], sizes = [1, 256], strides = [1, 1]} : vector<4x256xf32> to vector<1x256xf32>
    %29 = vector.broadcast %28 : vector<1x256xf32> to vector<4x256xf32>
    %30 = arith.mulf %27, %29 : vector<4x256xf32>
    %cst_19 = arith.constant dense<0.000000e+00> : vector<8x256xf32>
    %31 = tpu.matmul %9, %30, %cst_19 {dimension_numbers = #tpu.dot_dimension_numbers<[1], [0], [0], [1], [0, 0, 1, 1], [], []>} : vector<8x4xf32>, vector<4x256xf32>, vector<8x256xf32> -> vector<8x256xf32>
    %32 = arith.addf %26, %31 : vector<8x256xf32>
    %c240_i32 = arith.constant 240 : i32
    %33 = tpu.dynamic_rotate %13 by %c240_i32 dim 1 : vector<4x256xf32>, i32 -> vector<4x256xf32>
    %34 = vector.extract_strided_slice %0 {offsets = [3, 0], sizes = [1, 256], strides = [1, 1]} : vector<4x256xf32> to vector<1x256xf32>
    %35 = vector.broadcast %34 : vector<1x256xf32> to vector<4x256xf32>
    %36 = arith.mulf %33, %35 : vector<4x256xf32>
    %cst_20 = arith.constant dense<0.000000e+00> : vector<8x256xf32>
    %37 = tpu.matmul %11, %36, %cst_20 {dimension_numbers = #tpu.dot_dimension_numbers<[1], [0], [0], [1], [0, 0, 1, 1], [], []>} : vector<8x4xf32>, vector<4x256xf32>, vector<8x256xf32> -> vector<8x256xf32>
    %38 = arith.addf %32, %37 : vector<8x256xf32>
    %39 = vector.broadcast %1 : vector<8x1xf32> to vector<8x256xf32>
    %40 = arith.addf %38, %39 : vector<8x256xf32>
    %cst_21 = arith.constant 0.000000e+00 : f32
    %41 = vector.broadcast %cst_21 : f32 to vector<8x256xf32>
    %42 = arith.maximumf %40, %41 : vector<8x256xf32>
    %c0_22 = arith.constant 0 : index
    %c0_23 = arith.constant 0 : index
    %c0_24 = arith.constant 0 : index
    %43 = vector.load %arg5[%c0_22, %c0_23, %c0_24] : memref<1x8x256xf32, #tpu.memory_space<vmem>>, vector<1x8x256xf32>
    %44 = vector.shape_cast %43 : vector<1x8x256xf32> to vector<8x256xf32>
    %45 = vector.shape_cast %42 : vector<8x256xf32> to vector<1x8x256xf32>
    tpu.vector_store %arg5[%c0_22, %c0_23, %c0_24], %45 {strides = array<i32>} : memref<1x8x256xf32, #tpu.memory_space<vmem>>, vector<1x8x256xf32>,
    return
  }
  func.func @transform_0(%arg0: i32) -> (i32, i32, i32) {
    %c0_i32 = arith.constant 0 : i32
    %c0_i32_0 = arith.constant 0 : i32
    %c0_i32_1 = arith.constant 0 : i32
    return %arg0, %c0_i32, %c0_i32_0 : i32, i32, i32
  }
  func.func @transform_1(%arg0: i32) -> (i32, i32) {
    %c0_i32 = arith.constant 0 : i32
    %c0_i32_0 = arith.constant 0 : i32
    %c0_i32_1 = arith.constant 0 : i32
    return %c0_i32, %c0_i32_0 : i32, i32
  }
  func.func @transform_2(%arg0: i32) -> (i32, i32, i32) {
    %c0_i32 = arith.constant 0 : i32
    %c0_i32_0 = arith.constant 0 : i32
    %c0_i32_1 = arith.constant 0 : i32
    %c0_i32_2 = arith.constant 0 : i32
    return %c0_i32, %c0_i32_0, %c0_i32_1 : i32, i32, i32
  }
  func.func @transform_3(%arg0: i32) -> (i32, i32) {
    %c0_i32 = arith.constant 0 : i32
    %c0_i32_0 = arith.constant 0 : i32
    %c0_i32_1 = arith.constant 0 : i32
    return %c0_i32, %c0_i32_0 : i32, i32
  }
  func.func @transform_4(%arg0: i32) -> (i32, i32, i32) {
    %c0_i32 = arith.constant 0 : i32
    %c0_i32_0 = arith.constant 0 : i32
    %c0_i32_1 = arith.constant 0 : i32
    return %arg0, %c0_i32, %c0_i32_0 : i32, i32, i32
  }
}

</mosaic_0001>

<bundles_post_ra>
// kernel: tpu_custom_call.1
= control target key start
LH: loop header
LB: loop body
LE: loop exit
PB: predicated region body
PF: predicated region fallthrough
CT: control target
= control target key end

     0   :  { %9 = vsyncpa [#allocation3], 0  ;;  %s937_s0 = inlined_call_operand.vmem [shape: f32[2,4,256], index: 0, kind: input, shape index: {}]   ;;  %s938_s1 = inlined_call_operand.vmem [shape: f32[4,256], index: 1, kind: input, shape index: {}]   ;;  %s939_s2 = inlined_call_operand.vmem [shape: f32[5,8,4], index: 2, kind: input, shape index: {}]   ;;  %s940_s3 = inlined_call_operand.vmem [shape: f32[8,1], index: 3, kind: input, shape index: {}]   ;;  %s941_s4 = inlined_call_operand.hbm [shape: f32[2,8,256], index: 4, kind: output, shape index: {}]  }
   0x1   :  { %11 = vsyncpa [#allocation3 + $0x1], 0  ;;  %s811_s15 = smov 0   ;;  %s813_s16 = smov 0  }
   0x2   :  { %s815_s17 = smov 0   ;;  %s817_s18 = smov 0  }
   0x3 LB: > { %s832_s19 = sadd.s32 4294967295, %s779_s18   ;;  %s633_s20 = sadd.s32 4294967294, %s779_s18   ;;  %s779_s18 = sphi %s817_s18, %s947_s18   ;;  %s775_s17 = sphi %s815_s17, %s946_s17   ;;  %s771_s16 = sphi %s813_s16, %s945_s16   ;;  %s767_s15 = sphi %s811_s15, %s944_s15  }
   0x4   : > { %s836_s21 = sadd.s32 1, %s779_s18   ;;  %s113_s22 = sadd.s32 1, %s775_s17 }
   0x5   : > { %s110_s23 = ssub.s32 %s779_s18, %s836_s21  ;;  %p123_p0 = scmp.ne.s32.totalorder %s775_s17, %s771_s16 }
   0x6   : > { %p111_p1 = scmp.eq.s32.totalorder %s110_s23, 0  ;;  %p124_p2 = scmp.eq.s32.totalorder %s832_s19, 1 }
   0x7   : > { %p129_p3 = scmp.ne.s32.totalorder %s771_s16, %s767_s15  ;;  %p130_p4 = scmp.eq.s32.totalorder %s633_s20, 1 }
   0x8   : > { %s847_s24 = scalar_select %p111_p1, %s775_s17, %s113_s22  }
   0x9   : > { %p849_p5 = por %p124_p2, %p123_p0  ;;  %p853_p6 = por %p130_p4, %p129_p3 }
   0xa   : > { %p636_p7 = scmp.ge.s32.totalorder %s779_s18, 1  ;;  %p165_p8 = scmp.lt.s32.totalorder %s779_s18, 3 }
   0xc   : > { %p166_p9 = pnand %p636_p7, %p165_p8 }
   0xd   : > { %p191_p10 = scmp.lt.s32.totalorder (!%p166_p9), %s832_s19, 1  ;;  %s781_s6 = smov (!%p166_p9), 1  }
   0xe   : > { %169 = sbr.rel (%p166_p9) target bundleno = 319 (0x13f), region = 36  ;;  %s782_s7 = smov (!%p166_p9), 127  }
   0xf   : > { %s783_s8 = smov (!%p166_p9), 16   ;;  %s784_s9 = smov (!%p166_p9), 112  }
  0x10   : > { %s737_s29 = scalar_lea.hbm (!%p166_p9), %s941_s4, 32 }
  0x13   : > { %s192_s27 = scalar_select %p191_p10, %s832_s19, 1  ;;  %vm236_vm0 = vcmask 1043456   ;;  %v198_v11 = vld [vmem:[%s939_s2] sm:$0xff]  ;;  %vm232_vm1 = vcmask 31744   ;;  %v218_v12 = vlaneseq  ;;  %v785_v24 = vmov 0   ;;  %v640_v37 = vld [vmem:[%s939_s2 + $0x8] sm:$0xff] }
  0x14   : > { %v196_v13 = vld [vmem:[%s938_s1] sm:$0xff]  ;;  %715 = vset.pattern.permute.xlu2 %v785_v24  ;;  %716 = vset.pattern.permute.xlu0 %v785_v24  ;;  %v642_v38 = vld [vmem:[%s939_s2 + $0x18] sm:$0xff]  ;;  %v641_v49 = vld [vmem:[%s939_s2 + $0x10] sm:$0xff] }
  0x15   : > { %s669_s28 = sshll.u32 %s192_s27, 3  ;;  %v219_v16 = vand.u32 127, %v218_v12  ;;  %v224_v17 = vperm.slane %v196_v13, 0  ;;  %v225_v18 = vperm.slane %v196_v13, 4  ;;  %v416_v19 = vperm.slane %v196_v13, 2  ;;  %v197_v21 = vld [vmem:[%s940_s3] sm:$0xff] }
  0x16   : > { %s195_s5 = scalar_lea.vmem %s937_s0, %s669_s28  ;;  %v417_v20 = vperm.slane %v196_v13, 6  ;;  %v345_v40 = vperm.slane %v196_v13, 1  ;;  %v346_v41 = vperm.slane %v196_v13, 5  ;;  %v487_v50 = vperm.slane %v196_v13, 3  ;;  %v643_v60 = vld [vmem:[%s939_s2 + $0x20] sm:$0xff] }
  0x17   : > { %v207_v0 = vld [vmem:[%s195_s5] sm:$0xff]  ;;  %vm220_vm2 = vcmp.lt.s32.totalorder %v219_v16, 1  ;;  %v228_v22 = vperm.slane %v224_v17, 0  ;;  %v229_v23 = vperm.slane %v225_v18, 0  ;;  %vm413_vm3 = vcmp.lt.s32.totalorder %v219_v16, 16 }
  0x18   : > { %209 = vst [vmem:[#allocation1] ss:$2 sm:$0xff] %v207_v0  ;;  %v420_v25 = vperm.slane %v416_v19, 2  ;;  %v421_v26 = vperm.slane %v417_v20, 2  ;;  %vm342_vm4 = vcmp.lt.s32.totalorder %v219_v16, 127  ;;  %v349_v42 = vperm.slane %v345_v40, 1 }
  0x19   : > { %v350_v43 = vperm.slane %v346_v41, 1  ;;  %v488_v51 = vperm.slane %v196_v13, 7  ;;  %vm484_vm5 = vcmp.lt.s32.totalorder %v219_v16, 112  ;;  %v491_v52 = vperm.slane %v487_v50, 3 }
  0x1b   : > { %v492_v53 = vperm.slane %v488_v51, 3 }
  0x1f   : > { %v210_v1 = vld.sshfl [vmem:[#allocation1] sm:$0xff pattern:$0x75316420]  ;;  %v211_v2 = vld.sshfl [vmem:[#allocation1 + $0x8] sm:$0xff pattern:$0x75316420] }
  0x20   : > { %214 = vrot.lane.b32.xlu0 %v210_v1, %s781_s6  ;;  %283 = vst [vmem:[#allocation1] ss:$2 sm:$0xff] %v207_v0 }
  0x27   : > { %v284_v3 = vld.sshfl [vmem:[#allocation1] sm:$0xff pattern:$0x75316420]  ;;  %v285_v4 = vld.sshfl [vmem:[#allocation1 + $0x8] sm:$0xff pattern:$0x75316420] }
  0x28   : > { %216 = vrot.lane.b32.xlu0 %v211_v2, %s781_s6  ;;  %333 = vst [vmem:[#allocation1] ss:$2 sm:$0xff] %v207_v0  ;;  %648 = vmatpush.msk.msra.mxu2 %vm236_vm0, %v284_v3 }
  0x29   : > { %650 = vmatpush.msk.msra.mxu3 %vm236_vm0, %v285_v4  ;;  %649 = vmatmul.msk.f32.vlgmr.msra.gmra.mxu2 %vm232_vm1, %v198_v11 }
  0x2a   : > { %651 = vmatmul.msk.f32.vlgmr.msra.gmra.mxu3 %vm232_vm1, %v198_v11 }
  0x2f   : > { %v334_v5 = vld.sshfl [vmem:[#allocation1] sm:$0xff pattern:$0x75316420]  ;;  %v335_v6 = vld.sshfl [vmem:[#allocation1 + $0x8] sm:$0xff pattern:$0x75316420] }
  0x30   : > { %338 = vrot.lane.b32.xlu1 %v334_v5, %s782_s7  ;;  %404 = vst [vmem:[#allocation1] ss:$2 sm:$0xff] %v207_v0 }
  0x37   : > { %v406_v7 = vld.sshfl [vmem:[#allocation1 + $0x8] sm:$0xff pattern:$0x75316420]  ;;  %v405_v8 = vld.sshfl [vmem:[#allocation1] sm:$0xff pattern:$0x75316420] }
  0x38   : > { %340 = vrot.lane.b32.xlu1 %v335_v6, %s782_s7  ;;  %409 = vrot.lane.b32.xlu2 %v405_v8, %s783_s8  ;;  %475 = vst [vmem:[#allocation1] ss:$2 sm:$0xff] %v207_v0  ;;  %s188_s7 = sand.u32 1, %s771_s16  }
  0x3f   : > { %v477_v9 = vld.sshfl [vmem:[#allocation1 + $0x8] sm:$0xff pattern:$0x75316420]  ;;  %v476_v10 = vld.sshfl [vmem:[#allocation1] sm:$0xff pattern:$0x75316420] }
  0x40   : > { %482 = vrot.lane.b32.xlu1 %v477_v9, %s784_s9  ;;  %480 = vrot.lane.b32.xlu0 %v476_v10, %s784_s9  ;;  %s670_s9 = sshll.u32 %s832_s19, 4  ;;  %s558_s19 = scalar_lea.sflag [#allocation3], %s188_s7 }
  0x41   : > { %411 = vrot.lane.b32.xlu2 %v406_v7, %s783_s8  ;;  %s637_s8 = sshll.u32 %s188_s7, 4  ;;  %s569_s12 = scalar_lea.hbm %s941_s4, %s670_s9 }
  0x42   : > { %s190_s13 = scalar_lea.vmem [#allocation2], %s637_s8  ;;  %s573_s20 = sshll.u32 %s569_s12, 4  ;;  %s574_s20 = int_to_ptr.hbm [resolvable:$true] %s573_s20 }
  0x43   : > { %s571_s14 = sshll.u32 %s190_s13, 4  ;;  %s731_s22 = sshra.s32 %s574_s20, 4  ;;  %s572_s14 = int_to_ptr.vmem [resolvable:$true] %s571_s14  ;;  %s732_s22 = int_to_ptr.hbm [resolvable:$true] %s731_s22 }
  0x44   : > { %s733_s23 = scalar_lea.hbm %s732_s22, 16  ;;  %p738_p0 = scmp.lt.s32.totalorder %s732_s22, %s941_s4 }
  0x45   : > { %p734_p11 = scmp.ne.s32.totalorder %s732_s22, %s733_s23  ;;  %p739_p1 = scmp.lt.s32.totalorder %s737_s29, %s733_s23 }
  0x47   : > { %p735_p12 = pnand %p734_p11, %p849_p5  ;;  %p740_p2 = por %p739_p1, %p738_p0 }
  0x49   : > { %548 = vperm.xlu2 %715, %v197_v21   ;;  %p736_p13 = pneg %p735_p12 }
  0x4b   : > { %p741_p3 = pnand %p740_p2, %p736_p13 }
  0x92   : > { %v215_v14 = vpop.permute.xlu0 %214  ;;  %v410_v15 = vpop.permute.xlu2 %409 }
  0x9a   : > { %v217_v27 = vpop.permute.xlu0 %216 }
  0x9b   : > { %v221_v28 = vsel %vm220_vm2, %v215_v14, %v217_v27  ;;  %v222_v29 = vsel %vm220_vm2, %v217_v27, %v215_v14  ;;  %v412_v30 = vpop.permute.xlu2 %411 }
  0x9c   : > { %v414_v31 = vsel %vm413_vm3, %v410_v15, %v412_v30  ;;  %v415_v32 = vsel %vm413_vm3, %v412_v30, %v410_v15  ;;  %v230_v33 = vmul.f32 %v228_v22, %v222_v29  ;;  %v231_v34 = vmul.f32 %v229_v23, %v221_v28 }
  0x9d   : > { %v422_v35 = vmul.f32 %v420_v25, %v415_v32  ;;  %v423_v36 = vmul.f32 %v421_v26, %v414_v31 }
  0x9e   : > { %644 = vmatpush.msk.msra.mxu0 %vm236_vm0, %v230_v33  ;;  %646 = vmatpush.msk.msra.mxu1 %vm236_vm0, %v231_v34 }
  0x9f   : > { %656 = vmatpush.msk.msrb.mxu2 %vm236_vm0, %v422_v35  ;;  %658 = vmatpush.msk.msrb.mxu3 %vm236_vm0, %v423_v36 }
  0xa0   : > { %645 = vmatmul.msk.f32.vlgmr.msra.gmra.mxu0 %vm232_vm1, %v640_v37  ;;  %647 = vmatmul.msk.f32.vlgmr.msra.gmra.mxu1 %vm232_vm1, %v640_v37 }
  0xa1   : > { %657 = vmatmul.msk.f32.vlgmr.msrb.gmra.mxu2 %vm232_vm1, %v642_v38  ;;  %659 = vmatmul.msk.f32.vlgmr.msrb.gmra.mxu3 %vm232_vm1, %v642_v38 }
  0xa2   : > { %v339_v39 = vpop.permute.xlu1 %338 }
  0xa3   : > { %v549_v11 = vpop.permute.xlu2 %548 }
  0xaa   : > { %v341_v44 = vpop.permute.xlu1 %340 }
  0xab   : > { %v343_v45 = vsel %vm342_vm4, %v339_v39, %v341_v44  ;;  %v344_v46 = vsel %vm342_vm4, %v341_v44, %v339_v39 }
  0xac   : > { %v351_v47 = vmul.f32 %v349_v42, %v343_v45  ;;  %v352_v48 = vmul.f32 %v350_v43, %v344_v46  ;;  %v310_v63 = vpop.f32.mrf.mxu2 }
  0xad   : > { %v330_v0 = vpop.f32.mrf.mxu3 }
  0xae   : > { %652 = vmatpush.msk.msrb.mxu0 %vm236_vm0, %v351_v47  ;;  %654 = vmatpush.msk.msrb.mxu1 %vm236_vm0, %v352_v48 }
  0xaf   : > { %653 = vmatmul.msk.f32.vlgmr.msrb.gmra.mxu0 %vm232_vm1, %v641_v49  ;;  %655 = vmatmul.msk.f32.vlgmr.msrb.gmra.mxu1 %vm232_vm1, %v641_v49 }
  0xb2   : > { %v483_v54 = vpop.permute.xlu1 %482  ;;  %v481_v55 = vpop.permute.xlu0 %480 }
  0xb3   : > { %v485_v56 = vsel %vm484_vm5, %v481_v55, %v483_v54  ;;  %v486_v57 = vsel %vm484_vm5, %v483_v54, %v481_v55 }
  0xb4   : > { %v493_v58 = vmul.f32 %v491_v52, %v485_v56  ;;  %v494_v59 = vmul.f32 %v492_v53, %v486_v57 }
  0xb6   : > { %660 = vmatpush.msk.msra.mxu0 %vm236_vm0, %v493_v58  ;;  %662 = vmatpush.msk.msra.mxu1 %vm236_vm0, %v494_v59 }
  0xb7   : > { %661 = vmatmul.msk.f32.vlgmr.msra.gmra.mxu0 %vm232_vm1, %v643_v60  ;;  %663 = vmatmul.msk.f32.vlgmr.msra.gmra.mxu1 %vm232_vm1, %v643_v60 }
 0x11d   : > { %v260_v61 = vpop.f32.mrf.mxu0  ;;  %v280_v62 = vpop.f32.mrf.mxu1 }
 0x11e   : > { %v311_v3 = vadd.f32 %v310_v63, %v260_v61  ;;  %v331_v4 = vadd.f32 %v330_v0, %v280_v62 }
 0x124   : > { %v450_v7 = vpop.f32.mrf.mxu2  ;;  %v470_v8 = vpop.f32.mrf.mxu3 }
 0x12c   : > { %v379_v1 = vpop.f32.mrf.mxu0  ;;  %v399_v2 = vpop.f32.mrf.mxu1 }
 0x12d   : > { %v402_v5 = vadd.f32 %v379_v1, %v311_v3  ;;  %v403_v6 = vadd.f32 %v399_v2, %v331_v4 }
 0x12f   : > { %v473_v9 = vadd.f32 %v450_v7, %v402_v5  ;;  %v474_v10 = vadd.f32 %v470_v8, %v403_v6 }
 0x134   : > { %v521_v12 = vpop.f32.mrf.mxu0  ;;  %v541_v13 = vpop.f32.mrf.mxu1 }
 0x135   : > { %v544_v14 = vadd.f32 %v521_v12, %v473_v9  ;;  %v545_v15 = vadd.f32 %v541_v13, %v474_v10 }
 0x137   : > { %v551_v16 = vadd.f32 %v549_v11, %v544_v14  ;;  %v552_v17 = vadd.f32 %v549_v11, %v545_v15 }
 0x139   : > { %v553_v18 = vmax.f32 %v551_v16, 0.0  ;;  %v554_v19 = vmax.f32 %v552_v17, 0.0 }
 0x13b   : > { %555 = vst [vmem:[%s190_s13] sm:$0xff] %v553_v18 }
 0x13c   : > { %556 = vst [vmem:[%s190_s13 + $0x8] sm:$0xff] %v554_v19 }
 0x13d   : > { %744 = shalt.err (!%p741_p3)
}
 0x13e   : > { %671 = dma.vmem_to_hbm [thread:$0]  (%p849_p5), %s572_s14, 256, %s574_s20, %s558_s19  }
 0x13f PF: > { %p677_p4 = scmp.ge.s32.totalorder %s779_s18, 2  ;;  %s585_s6 = sand.u32 1, %s767_s15  }
 0x140   : > { %s586_s7 = scalar_lea.sflag [#allocation3], %s585_s6 }
 0x141   : > { %p674_p7 = pnand %p677_p4, %p853_p6 }
 0x143   : > { %p675_p8 = pneg %p674_p7 }
 0x145   : > { %762 = dma.done.wait (%p675_p8), %s586_s7, 256  }
 0x146   : > { %764 = vsyncadd (%p675_p8), %s586_s7, 4294967040  ;;  %p14_p9 = scmp.ge.s32.totalorder %s836_s21, 4   ;;  %s944_s15 = smov %s771_s16 }
 0x147   : > { %s945_s16 = smov %s775_s17  ;;  %s946_s17 = smov %s847_s24 }
 0x148   : > { %s947_s18 = smov %s836_s21  ;;  %16 = sbr.rel (!%p14_p9) target bundleno = 3 (0x3), region = 75 }
 0x14d   :  { %592 = vsyncpa [#allocation3], 1 }
 0x14e   :  { %594 = vsyncpa [#allocation3 + $0x1], 1 }

</bundles_post_ra>
